<compile_context>
chip_gen: v6e
topology: v6e:2x2x1
jax: 0.10.0
libtpu: 0.0.40
codegen_flags: <defaults>
</compile_context>

<pallas_src>
import jax
import jax.numpy as jnp
from jax.experimental import pallas as pl
from jax.experimental.pallas import tpu as pltpu

HIDDEN = 50


def _round_up(x, m):
    return ((x + m - 1) // m) * m


def _discriminator_kernel(data_ref, cond_ref, w1d_ref, w1c_ref, b1_ref,
                          w2_ref, b2_ref, out_ref):
    """One batch tile of the fused MLP, feature-major.

    data_ref: (Dd, TB)     activation tile (data part), batch in lanes
    cond_ref: (Dc, TB)     activation tile (cond part), batch in lanes
    w1d_ref : (50, Dd)     first-layer weights for the data columns (transposed)
    w1c_ref : (50, Dc)     first-layer weights for the cond columns (transposed)
    b1_ref  : (50, 1)      first-layer bias as a column
    w2_ref  : (1, 50)      second-layer weight as a row vector
    b2_ref  : (1,)         scalar bias, SMEM
    out_ref : (1, TB)      lane-dense sigmoid outputs for this tile
    """
    # Layer 1 (concat-free): two MXU matmuls with batch on the N side.
    h = jnp.dot(w1d_ref[...], data_ref[...],
                preferred_element_type=jnp.float32)            # (50, TB)
    h = h + jnp.dot(w1c_ref[...], cond_ref[...],
                    preferred_element_type=jnp.float32)
    h = jnp.tanh(h + b1_ref[...])                              # (50, TB), f32

    # Layer 2: native (1,50) @ (50,TB) MXU matmul -> lane-dense (1, TB).
    logit = jnp.dot(w2_ref[...], h, preferred_element_type=jnp.float32)
    out_ref[...] = jax.nn.sigmoid(logit + b2_ref[0])


def discriminator_forward(data, cond_info, params, *, max_block_b=8192):
    """data: (B, output_dim), cond_info: (B, cond_dim) -> (B, 1) float32."""
    w1d_t, w1c_t, b1_col, w2_row, b2 = params
    B, Dd = data.shape
    Dc = cond_info.shape[1]

    # PyTorch module does .float(); keep f32 compute (no wrapper bf16 pass).
    data = data.astype(jnp.float32)
    cond_info = cond_info.astype(jnp.float32)

    # --- batch-tile selection (divisibility-free) -------------------------
    # tb: multiple of 256 (full MXU N fill), capped at max_block_b.  For
    # B >= 512 aim for >= 2 grid steps so v7x megacore can split the batch.
    target_steps = 2 if B >= 512 else 1
    tb = _round_up(max(1, -(-B // target_steps)), 256)
    tb = min(tb, _round_up(max_block_b, 256))
    B_pad = _round_up(B, tb)
    grid = (B_pad // tb,)

    # Feature-major activations: transpose once here (ideally the producer
    # would emit (D, B) directly), then pad batch (lanes) up to B_pad.
    data_t = jnp.transpose(data)            # (Dd, B)
    cond_t = jnp.transpose(cond_info)       # (Dc, B)
    if B_pad != B:
        pad = ((0, 0), (0, B_pad - B))
        data_t = jnp.pad(data_t, pad)
        cond_t = jnp.pad(cond_t, pad)

    d_in = Dd + Dc
    cost = pl.CostEstimate(
        flops=int(2 * B_pad * (d_in + 1) * HIDDEN),
        transcendentals=int(B_pad * (HIDDEN + 1)),
        bytes_accessed=int(4 * (B_pad * d_in            # activations in
                                + d_in * HIDDEN + HIDDEN  # W1 + b1
                                + HIDDEN + 1              # W2 + b2
                                + B_pad)),                # output
    )

    out = pl.pallas_call(
        _discriminator_kernel,
        out_shape=jax.ShapeDtypeStruct((1, B_pad), jnp.float32),
        grid=grid,
        in_specs=[
            # Activations: tiled along batch (lane dim), double-buffered.
            pl.BlockSpec((Dd, tb), lambda i: (0, i)),
            pl.BlockSpec((Dc, tb), lambda i: (0, i)),
            # Weights / biases: constant index map -> DMA'd once, stay resident.
            pl.BlockSpec((HIDDEN, Dd), lambda i: (0, 0)),
            pl.BlockSpec((HIDDEN, Dc), lambda i: (0, 0)),
            pl.BlockSpec((HIDDEN, 1), lambda i: (0, 0)),
            pl.BlockSpec((1, HIDDEN), lambda i: (0, 0)),
            # Scalar second-layer bias lives in SMEM, outside the tiled pipeline.
            pl.BlockSpec(memory_space=pltpu.MemorySpace.SMEM),
        ],
        out_specs=pl.BlockSpec((1, tb), lambda i: (0, i)),
        compiler_params=pltpu.CompilerParams(
            dimension_semantics=("parallel",)),
        cost_estimate=cost,
    )(data_t, cond_t, w1d_t, w1c_t, b1_col, w2_row, b2)

    # Padded batch columns produce garbage sigmoid values; slice them off.
    return out[0, :B].reshape(B, 1)


def init_params(key, output_dim, cond_dim):
    """Init mimicking PyTorch nn.Linear defaults (uniform +/- 1/sqrt(fan_in)).

    W1 is stored pre-split (data / cond columns) and pre-transposed as
    (HIDDEN, in); b1 as a (HIDDEN, 1) column; W2 as a (1, HIDDEN) row; b2 (1,).
    """
    d_in = output_dim + cond_dim
    k1, k2, k3, k4 = jax.random.split(key, 4)
    bound1 = 1.0 / float(d_in) ** 0.5
    bound2 = 1.0 / float(HIDDEN) ** 0.5
    w1_t = jax.random.uniform(k1, (HIDDEN, d_in), jnp.float32, -bound1, bound1)
    w1d_t = w1_t[:, :output_dim]                       # (50, Dd)
    w1c_t = w1_t[:, output_dim:]                       # (50, Dc)
    b1_col = jax.random.uniform(k2, (HIDDEN, 1), jnp.float32, -bound1, bound1)
    w2_row = jax.random.uniform(k3, (1, HIDDEN), jnp.float32, -bound2, bound2)
    b2 = jax.random.uniform(k4, (1,), jnp.float32, -bound2, bound2)
    return w1d_t, w1c_t, b1_col, w2_row, b2


def reference_forward(data, cond_info, params):
    """Pure-JAX reference of the PyTorch module."""
    w1d_t, w1c_t, b1_col, w2_row, b2 = params
    x = jnp.concatenate([data, cond_info], axis=1).astype(jnp.float32)
    w1 = jnp.concatenate([w1d_t, w1c_t], axis=1)       # (50, d_in)
    h = jnp.tanh(x @ w1.T + b1_col.T)                  # (B, 50)
    return jax.nn.sigmoid(h @ w2_row.T + b2[None, :])  # (B, 1)


if __name__ == "__main__":
    key = jax.random.PRNGKey(0)
    k_data, k_cond, k_params = jax.random.split(key, 3)

    batch = 8
    output_dim = 6
    cond_dim = 4

    data = jax.random.normal(k_data, (batch, output_dim), jnp.float32)
    cond = jax.random.normal(k_cond, (batch, cond_dim), jnp.float32)
    params = init_params(k_params, output_dim, cond_dim)

    out = discriminator_forward(data, cond, params)
    jax.block_until_ready(out)

    ref = reference_forward(data, cond, params)
    assert out.shape == (batch, 1)
    assert jnp.allclose(out, ref, atol=1e-5, rtol=1e-5)

    print("KERNEL_OK")
</pallas_src>

<mosaic_0001>
module attributes {stable_mosaic.version = 11 : i64} {
  func.func @_discriminator_kernel(%arg0: i32, %arg1: memref<6x256xf32, #tpu.memory_space<vmem>>, %arg2: memref<4x256xf32, #tpu.memory_space<vmem>>, %arg3: memref<50x6xf32, #tpu.memory_space<vmem>>, %arg4: memref<50x4xf32, #tpu.memory_space<vmem>>, %arg5: memref<50x1xf32, #tpu.memory_space<vmem>>, %arg6: memref<1x50xf32, #tpu.memory_space<vmem>>, %arg7: memref<1xf32, #tpu.memory_space<smem>>, %arg8: memref<1x256xf32, #tpu.memory_space<vmem>>) attributes {dimension_semantics = [#tpu.dimension_semantics<parallel>], iteration_bounds = array<i64: 1>, scalar_prefetch = 0 : i64, scratch_operands = 0 : i64, tpu.core_type = #tpu.core_type<tc>, window_params = [{transform_indices = @transform_0, window_bounds = array<i64: 6, 256>}, {transform_indices = @transform_1, window_bounds = array<i64: 4, 256>}, {pipeline_mode = #tpu.pipeline_mode<synchronous>, transform_indices = @transform_2, window_bounds = array<i64: 50, 6>}, {pipeline_mode = #tpu.pipeline_mode<synchronous>, transform_indices = @transform_3, window_bounds = array<i64: 50, 4>}, {pipeline_mode = #tpu.pipeline_mode<synchronous>, transform_indices = @transform_4, window_bounds = array<i64: 50, 1>}, {pipeline_mode = #tpu.pipeline_mode<synchronous>, transform_indices = @transform_5, window_bounds = array<i64: 1, 50>}, {transform_indices = @transform_6, window_bounds = array<i64: 1>}, {transform_indices = @transform_7, window_bounds = array<i64: 1, 256>}]} {
    %c0 = arith.constant 0 : index
    %c0_0 = arith.constant 0 : index
    %0 = vector.load %arg3[%c0, %c0_0] : memref<50x6xf32, #tpu.memory_space<vmem>>, vector<50x6xf32>
    %c0_1 = arith.constant 0 : index
    %c0_2 = arith.constant 0 : index
    %1 = vector.load %arg1[%c0_1, %c0_2] : memref<6x256xf32, #tpu.memory_space<vmem>>, vector<6x256xf32>
    %cst = arith.constant dense<0.000000e+00> : vector<50x256xf32>
    %2 = tpu.matmul %0, %1, %cst {dimension_numbers = #tpu.dot_dimension_numbers<[1], [0], [0], [1], [0, 0, 1, 1], [], []>} : vector<50x6xf32>, vector<6x256xf32>, vector<50x256xf32> -> vector<50x256xf32>
    %c0_3 = arith.constant 0 : index
    %c0_4 = arith.constant 0 : index
    %3 = vector.load %arg4[%c0_3, %c0_4] : memref<50x4xf32, #tpu.memory_space<vmem>>, vector<50x4xf32>
    %c0_5 = arith.constant 0 : index
    %c0_6 = arith.constant 0 : index
    %4 = vector.load %arg2[%c0_5, %c0_6] : memref<4x256xf32, #tpu.memory_space<vmem>>, vector<4x256xf32>
    %cst_7 = arith.constant dense<0.000000e+00> : vector<50x256xf32>
    %5 = tpu.matmul %3, %4, %cst_7 {dimension_numbers = #tpu.dot_dimension_numbers<[1], [0], [0], [1], [0, 0, 1, 1], [], []>} : vector<50x4xf32>, vector<4x256xf32>, vector<50x256xf32> -> vector<50x256xf32>
    %6 = arith.addf %2, %5 : vector<50x256xf32>
    %c0_8 = arith.constant 0 : index
    %c0_9 = arith.constant 0 : index
    %7 = vector.load %arg5[%c0_8, %c0_9] : memref<50x1xf32, #tpu.memory_space<vmem>>, vector<50x1xf32>
    %8 = vector.broadcast %7 : vector<50x1xf32> to vector<50x256xf32>
    %9 = arith.addf %6, %8 : vector<50x256xf32>
    %10 = math.tanh %9 : vector<50x256xf32>
    %c0_10 = arith.constant 0 : index
    %c0_11 = arith.constant 0 : index
    %11 = vector.load %arg6[%c0_10, %c0_11] : memref<1x50xf32, #tpu.memory_space<vmem>>, vector<1x50xf32>
    %cst_12 = arith.constant dense<0.000000e+00> : vector<1x256xf32>
    %12 = tpu.matmul %11, %10, %cst_12 {dimension_numbers = #tpu.dot_dimension_numbers<[1], [0], [0], [1], [0, 0, 1, 1], [], []>} : vector<1x50xf32>, vector<50x256xf32>, vector<1x256xf32> -> vector<1x256xf32>
    %c0_13 = arith.constant 0 : index
    %13 = memref.load %arg7[%c0_13] : memref<1xf32, #tpu.memory_space<smem>>
    %14 = vector.broadcast %13 : f32 to vector<1x256xf32>
    %15 = arith.addf %12, %14 : vector<1x256xf32>
    %16 = arith.negf %15 : vector<1x256xf32>
    %17 = math.exp %16 : vector<1x256xf32>
    %cst_14 = arith.constant 1.000000e+00 : f32
    %18 = vector.broadcast %cst_14 : f32 to vector<1x256xf32>
    %19 = arith.addf %18, %17 : vector<1x256xf32>
    %20 = arith.divf %18, %19 : vector<1x256xf32>
    %c0_15 = arith.constant 0 : index
    %c0_16 = arith.constant 0 : index
    %21 = vector.load %arg8[%c0_15, %c0_16] : memref<1x256xf32, #tpu.memory_space<vmem>>, vector<1x256xf32>
    tpu.vector_store %arg8[%c0_15, %c0_16], %20 {strides = array<i32>} : memref<1x256xf32, #tpu.memory_space<vmem>>, vector<1x256xf32>,
    return
  }
  func.func @transform_0(%arg0: i32) -> (i32, i32) {
    %c0_i32 = arith.constant 0 : i32
    %c0_i32_0 = arith.constant 0 : i32
    return %c0_i32, %arg0 : i32, i32
  }
  func.func @transform_1(%arg0: i32) -> (i32, i32) {
    %c0_i32 = arith.constant 0 : i32
    %c0_i32_0 = arith.constant 0 : i32
    return %c0_i32, %arg0 : i32, i32
  }
  func.func @transform_2(%arg0: i32) -> (i32, i32) {
    %c0_i32 = arith.constant 0 : i32
    %c0_i32_0 = arith.constant 0 : i32
    %c0_i32_1 = arith.constant 0 : i32
    return %c0_i32, %c0_i32_0 : i32, i32
  }
  func.func @transform_3(%arg0: i32) -> (i32, i32) {
    %c0_i32 = arith.constant 0 : i32
    %c0_i32_0 = arith.constant 0 : i32
    %c0_i32_1 = arith.constant 0 : i32
    return %c0_i32, %c0_i32_0 : i32, i32
  }
  func.func @transform_4(%arg0: i32) -> (i32, i32) {
    %c0_i32 = arith.constant 0 : i32
    %c0_i32_0 = arith.constant 0 : i32
    %c0_i32_1 = arith.constant 0 : i32
    return %c0_i32, %c0_i32_0 : i32, i32
  }
  func.func @transform_5(%arg0: i32) -> (i32, i32) {
    %c0_i32 = arith.constant 0 : i32
    %c0_i32_0 = arith.constant 0 : i32
    %c0_i32_1 = arith.constant 0 : i32
    return %c0_i32, %c0_i32_0 : i32, i32
  }
  func.func @transform_6(%arg0: i32) -> i32 {
    %c0_i32 = arith.constant 0 : i32
    %c0_i32_0 = arith.constant 0 : i32
    return %c0_i32 : i32
  }
  func.func @transform_7(%arg0: i32) -> (i32, i32) {
    %c0_i32 = arith.constant 0 : i32
    %c0_i32_0 = arith.constant 0 : i32
    return %c0_i32, %arg0 : i32, i32
  }
}

</mosaic_0001>

<bundles_post_ra>
// kernel: tpu_custom_call.1
= control target key start
LH: loop header
LB: loop body
LE: loop exit
PB: predicated region body
PF: predicated region fallthrough
CT: control target
= control target key end

     0   :  { %vm203_vm0 = vcmask 1045504   ;;  %v609_v2 = vmov 0.0   ;;  %vm69_vm1 = vcmask 1043456   ;;  %vm181_vm2 = vcmask 48128   ;;  %s763_s0 = inlined_call_operand.vmem [shape: f32[6,256], index: 0, kind: input, shape index: {}]   ;;  %s764_s1 = inlined_call_operand.vmem [shape: f32[4,256], index: 1, kind: input, shape index: {}]   ;;  %s765_s2 = inlined_call_operand.vmem [shape: f32[50,6], index: 2, kind: input, shape index: {}]   ;;  %s766_s3 = inlined_call_operand.vmem [shape: f32[50,4], index: 3, kind: input, shape index: {}]   ;;  %s767_s4 = inlined_call_operand.vmem [shape: f32[50,1], index: 4, kind: input, shape index: {}]   ;;  %s768_s5 = inlined_call_operand.vmem [shape: f32[1,50], index: 5, kind: input, shape index: {}]   ;;  %s769_s6 = inlined_call_operand.<no memory space> [shape: f32[1], index: 6, kind: input, shape index: {}]   ;;  %s770_s7 = inlined_call_operand.hbm [shape: f32[1,256], index: 7, kind: output, shape index: {}]  }
   0x1   :  { %v36_v0 = vld [vmem:[%s763_s0 + $0x8] sm:$0x3f]  ;;  %v35_v1 = vld [vmem:[%s763_s0] sm:$0x3f]  ;;  %274 = vmatprep.mubr.f32.mxu1 %v609_v2  ;;  %138 = vmatprep.mubr.f32.mxu0 %v609_v2  ;;  %vm47_vm3 = vcmask 31744   ;;  %v610_v7 = vmov 0  }
   0x2   :  { %530 = vmatprep.subr.msk.mxu1 %vm203_vm0, %v36_v0  ;;  %v44_v3 = vld [vmem:[%s764_s1] sm:$0xff]  ;;  %548 = vset.pattern.permute.xlu0 %v610_v7  ;;  %v29_v8 = vld [vmem:[%s765_s2 + $0x8] sm:$0xff]  ;;  %v323_v9 = vld [vmem:[%s767_s4 + $0x30] sm:$0x3] }
   0x3   :  { %v28_v4 = vld [vmem:[%s765_s2] sm:$0xff]  ;;  %531 = vmatpush1.msk.msra.mxu1 %vm203_vm0, %v35_v1  ;;  %v46_v5 = vcombine.high %v44_v3, %v44_v3  ;;  %549 = vset.pattern.permute.xlu1 %v610_v7  ;;  %v38_v11 = vld [vmem:[%s766_s3 + $0x8] sm:$0xff]  ;;  %v30_v12 = vld [vmem:[%s765_s2 + $0x10] sm:$0xff] }
   0x4   :  { %532 = vmatmul.mubr.msk.f32.vlgmr.msra.gmra.mxu1 %vm181_vm2, %v28_v4  ;;  %v37_v6 = vld [vmem:[%s766_s3] sm:$0xff]  ;;  %356 = vperm.xlu0 %548, %v323_v9  }
   0x5   :  { %521 = vmatprep.subr.msk.mxu0 %vm69_vm1, %v46_v5  ;;  %280 = vmatprep.mubr.f32.mxu1 %v609_v2  ;;  %v321_v10 = vld [vmem:[%s767_s4 + $0x20] sm:$0xff] }
   0x6   :  { %522 = vmatpush1.msk.msra.mxu0 %vm69_vm1, %v44_v3 }
   0x7   :  { %523 = vmatmul.mubr.msk.f32.vlgmr.msra.gmra.mxu0 %vm47_vm3, %v37_v6 }
   0x8   :  { %533 = vmatmul.mubr.msk.f32.gmra.mxu1 %vm181_vm2, %v29_v8  ;;  %144 = vmatprep.mubr.f32.mxu0 %v609_v2 }
   0x9   :  { %286 = vmatprep.mubr.f32.mxu1 %v609_v2 }
   0xa   :  { %13 = vsyncpa [#allocation4], 0  ;;  %v322_v13 = vld [vmem:[%s767_s4 + $0x28] sm:$0xff]  ;;  %346 = vperm.xlu1 %549, %v321_v10   ;;  %v320_v14 = vld [vmem:[%s767_s4 + $0x18] sm:$0xff]  ;;  %vm394_vm4 = vcmask 1041408   ;;  %vm390_vm5 = vcmask 408576  }
   0xb   :  { %524 = vmatmul.mubr.msk.f32.gmra.mxu0 %vm47_vm3, %v38_v11  ;;  %v39_v15 = vld [vmem:[%s766_s3 + $0x10] sm:$0xff]  ;;  %v31_v16 = vld [vmem:[%s765_s2 + $0x18] sm:$0xff]  ;;  %351 = vperm.xlu0 %548, %v322_v13   ;;  %v318_v18 = vld [vmem:[%s767_s4 + $0x8] sm:$0xff] }
   0xc   :  { %534 = vmatmul.mubr.msk.f32.gmra.mxu1 %vm181_vm2, %v30_v12  ;;  %150 = vmatprep.mubr.f32.mxu0 %v609_v2  ;;  %v319_v17 = vld [vmem:[%s767_s4 + $0x10] sm:$0xff]  ;;  %v40_v19 = vld [vmem:[%s766_s3 + $0x18] sm:$0xff]  ;;  %v32_v20 = vld [vmem:[%s765_s2 + $0x20] sm:$0xff] }
   0xd   :  { %292 = vmatprep.mubr.f32.mxu1 %v609_v2  ;;  %v317_v21 = vld [vmem:[%s767_s4] sm:$0xff]  ;;  %v33_v23 = vld [vmem:[%s765_s2 + $0x28] sm:$0xff]  ;;  %v34_v25 = vld [vmem:[%s765_s2 + $0x30] sm:$0x3] }
   0xe   :  { %341 = vperm.xlu1 %549, %v320_v14   ;;  %v41_v22 = vld [vmem:[%s766_s3 + $0x20] sm:$0xff]  ;;  %v42_v24 = vld [vmem:[%s766_s3 + $0x28] sm:$0xff]  ;;  %v43_v26 = vld [vmem:[%s766_s3 + $0x30] sm:$0x3] }
   0xf   :  { %525 = vmatmul.mubr.msk.f32.gmra.mxu0 %vm47_vm3, %v39_v15  ;;  %336 = vperm.xlu0 %548, %v319_v17  }
  0x10   :  { %535 = vmatmul.mubr.msk.f32.gmra.mxu1 %vm181_vm2, %v31_v16  ;;  %156 = vmatprep.mubr.f32.mxu0 %v609_v2 }
  0x11   :  { %298 = vmatprep.mubr.f32.mxu1 %v609_v2 }
  0x12   :  { %331 = vperm.xlu1 %549, %v318_v18  }
  0x13   :  { %526 = vmatmul.mubr.msk.f32.gmra.mxu0 %vm47_vm3, %v40_v19  ;;  %326 = vperm.xlu0 %548, %v317_v21  }
  0x14   :  { %536 = vmatmul.mubr.msk.f32.gmra.mxu1 %vm181_vm2, %v32_v20  ;;  %162 = vmatprep.mubr.f32.mxu0 %v609_v2 }
  0x15   :  { %304 = vmatprep.mubr.f32.mxu1 %v609_v2 }
  0x17   :  { %527 = vmatmul.mubr.msk.f32.gmra.mxu0 %vm47_vm3, %v41_v22 }
  0x18   :  { %537 = vmatmul.mubr.msk.f32.gmra.mxu1 %vm181_vm2, %v33_v23  ;;  %168 = vmatprep.mubr.f32.mxu0 %v609_v2 }
  0x19   :  { %310 = vmatprep.mubr.f32.mxu1 %v609_v2 }
  0x1b   :  { %528 = vmatmul.mubr.msk.f32.gmra.mxu0 %vm47_vm3, %v42_v24 }
  0x1c   :  { %538 = vmatmul.mubr.msk.f32.gmra.mxu1 %vm181_vm2, %v34_v25  ;;  %174 = vmatprep.mubr.f32.mxu0 %v609_v2 }
  0x1f   :  { %529 = vmatmul.mubr.msk.f32.gmra.mxu0 %vm47_vm3, %v43_v26 }
  0x20   :  { %465 = vmatprep.mubr.f32.mxu0 %v609_v2 }
  0x7f   :  { %v357_v48 = vpop.permute.xlu0 %356 }
  0x85   :  { %v347_v53 = vpop.permute.xlu1 %346 }
  0x86   :  { %v352_v55 = vpop.permute.xlu0 %351 }
  0x89   :  { %v342_v1 = vpop.permute.xlu1 %341 }
  0x8a   :  { %v337_v7 = vpop.permute.xlu0 %336 }
  0x8d   :  { %v332_v17 = vpop.permute.xlu1 %331 }
  0x8e   :  { %v327_v21 = vpop.permute.xlu0 %326 }
  0xc4   :  { %v276_v27 = vpop.f32.mrf.mxu1 }
  0xc6   :  { %v278_v28 = vpop.f32.mrf.mxu1 }
  0xc7   :  { %v140_v29 = vpop.f32.mrf.mxu0 }
  0xc8   :  { %v282_v30 = vpop.f32.mrf.mxu1  ;;  %v277_v19 = vadd.f32 %v276_v27, %v140_v29 }
  0xc9   :  { %v142_v31 = vpop.f32.mrf.mxu0 }
  0xca   :  { %v284_v32 = vpop.f32.mrf.mxu1  ;;  %v279_v16 = vadd.f32 %v278_v28, %v142_v31  ;;  %v359_v25 = vadd.f32 %v327_v21, %v277_v19 }
  0xcb   :  { %v146_v33 = vpop.f32.mrf.mxu0 }
  0xcc   :  { %v288_v34 = vpop.f32.mrf.mxu1  ;;  %v283_v14 = vadd.f32 %v282_v30, %v146_v33  ;;  %v360_v24 = vadd.f32 %v327_v21, %v279_v16 }
  0xcd   :  { %v148_v35 = vpop.f32.mrf.mxu0 }
  0xce   :  { %v290_v36 = vpop.f32.mrf.mxu1  ;;  %v285_v12 = vadd.f32 %v284_v32, %v148_v35  ;;  %v361_v23 = vadd.f32 %v332_v17, %v283_v14 }
  0xcf   :  { %v152_v37 = vpop.f32.mrf.mxu0 }
  0xd0   :  { %v294_v38 = vpop.f32.mrf.mxu1  ;;  %v289_v10 = vadd.f32 %v288_v34, %v152_v37  ;;  %v362_v22 = vadd.f32 %v332_v17, %v285_v12 }
  0xd1   :  { %v154_v39 = vpop.f32.mrf.mxu0 }
  0xd2   :  { %v296_v40 = vpop.f32.mrf.mxu1  ;;  %v291_v8 = vadd.f32 %v290_v36, %v154_v39  ;;  %v363_v20 = vadd.f32 %v337_v7, %v289_v10  ;;  %v387_v39 = vld [vmem:[%s768_s5] sm:$0x1]  ;;  %s612_s5 = smov [#allocation3]  }
  0xd3   :  { %v158_v41 = vpop.f32.mrf.mxu0 }
  0xd4   :  { %v300_v42 = vpop.f32.mrf.mxu1  ;;  %v295_v5 = vadd.f32 %v294_v38, %v158_v41  ;;  %v364_v18 = vadd.f32 %v337_v7, %v291_v8  ;;  %v389_v41 = vstv %s769_s6  ;;  %s513_s6 = sshll.u32 %s612_s5, 4  ;;  %s514_s6 = int_to_ptr.vmem [resolvable:$true] %s513_s6 }
  0xd5   :  { %v160_v43 = vpop.f32.mrf.mxu0  ;;  %s587_s23 = scalar_lea.vmem %s514_s6, 32  ;;  %p592_p1 = scmp.lt.s32.totalorder %s514_s6, %s514_s6 }
  0xd6   :  { %v302_v44 = vpop.f32.mrf.mxu1  ;;  %v297_v2 = vadd.f32 %v296_v40, %v160_v43  ;;  %v365_v15 = vadd.f32 %v342_v1, %v295_v5  ;;  %p588_p0 = scmp.ne.s32.totalorder %s514_s6, %s587_s23  ;;  %p593_p2 = scmp.lt.s32.totalorder %s587_s23, %s587_s23 }
  0xd7   :  { %v164_v45 = vpop.f32.mrf.mxu0 }
  0xd8   :  { %v306_v46 = vpop.f32.mrf.mxu1  ;;  %v301_v63 = vadd.f32 %v300_v42, %v164_v45  ;;  %v366_v13 = vadd.f32 %v342_v1, %v297_v2  ;;  %p594_p3 = por %p593_p2, %p592_p1 }
  0xd9   :  { %v166_v47 = vpop.f32.mrf.mxu0 }
  0xda   :  { %v308_v49 = vpop.f32.mrf.mxu1  ;;  %v303_v61 = vadd.f32 %v302_v44, %v166_v47  ;;  %v367_v11 = vadd.f32 %v347_v53, %v301_v63  ;;  %p595_p4 = pnand %p594_p3, %p588_p0 }
  0xdb   :  { %v170_v50 = vpop.f32.mrf.mxu0 }
  0xdc   :  { %v312_v52 = vpop.f32.mrf.mxu1  ;;  %v307_v58 = vadd.f32 %v306_v46, %v170_v50  ;;  %v368_v9 = vadd.f32 %v347_v53, %v303_v61 }
  0xdd   :  { %v172_v51 = vpop.f32.mrf.mxu0 }
  0xde   :  { %v309_v56 = vadd.f32 %v308_v49, %v172_v51  ;;  %v314_v59 = vpop.f32.mrf.mxu1  ;;  %v369_v6 = vadd.f32 %v352_v55, %v307_v58 }
  0xdf   :  { %v176_v54 = vpop.f32.mrf.mxu0 }
  0xe0   :  { %v313_v57 = vadd.f32 %v312_v52, %v176_v54  ;;  %v370_v3 = vadd.f32 %v352_v55, %v309_v56  ;;  %v611_v52 = vmov 1966171168   ;;  %v490_v54 = vlaneseq }
  0xe1   :  { %v178_v60 = vpop.f32.mrf.mxu0  ;;  %v488_v53 = vunpack.c.l.s4 %v611_v52 }
  0xe2   :  { %v315_v62 = vadd.f32 %v314_v59, %v178_v60  ;;  %v371_v0 = vadd.f32 %v357_v48, %v313_v57  ;;  %v491_v56 = vshrl.u32 %v490_v54, 7  ;;  %vm504_vm6 = vcmp.lt.s32.totalorder %v490_v54, 256 }
  0xe3   :  { %v489_v55 = vunpack.c.0.s8 %v488_v53 }
  0xe4   :  { %v372_v4 = vadd.f32 %v357_v48, %v315_v62 }
  0xe5   :  { %v492_v58 = vsub.s32 %v489_v55, %v491_v56 }
  0xe6   :  { %551 = vtanh.f32 %v372_v4 }
  0xe7   :  { %553 = vtanh.f32 %v371_v0 }
  0xe8   :  { %555 = vtanh.f32 %v370_v3 }
  0xe9   :  { %557 = vtanh.f32 %v369_v6 }
  0xea   :  { %559 = vtanh.f32 %v368_v9 }
  0xeb   :  { %561 = vtanh.f32 %v367_v11 }
  0xec   :  { %563 = vtanh.f32 %v366_v13 }
  0xed   :  { %565 = vtanh.f32 %v365_v15 }
  0xee   :  { %567 = vtanh.f32 %v364_v18 }
  0xef   :  { %569 = vtanh.f32 %v363_v20 }
  0xf0   :  { %571 = vtanh.f32 %v362_v22 }
  0xf1   :  { %573 = vtanh.f32 %v361_v23 }
  0xf2   :  { %575 = vtanh.f32 %v360_v24 }
  0xf3   :  { %v552_v26 = vpop.eup %551  ;;  %577 = vtanh.f32 %v359_v25 }
  0xf4   :  { %v554_v28 = vpop.eup %553  ;;  %539 = vmatprep.subr.msk.mxu0 %vm394_vm4, %v552_v26 }
  0xf5   :  { %v556_v27 = vpop.eup %555  ;;  %540 = vmatpush1.msk.msra.mxu0 %vm394_vm4, %v554_v28 }
  0xf6   :  { %v558_v29 = vpop.eup %557  ;;  %421 = vmatprep.subr.mxu0 %v556_v27 }
  0xf7   :  { %v560_v30 = vpop.eup %559  ;;  %422 = vmatpush1.msra.mxu0 %v558_v29 }
  0xf8   :  { %v562_v31 = vpop.eup %561  ;;  %423 = vmatprep.subr.mxu0 %v560_v30 }
  0xf9   :  { %v564_v32 = vpop.eup %563  ;;  %424 = vmatpush1.msra.mxu0 %v562_v31 }
  0xfa   :  { %v566_v33 = vpop.eup %565  ;;  %425 = vmatprep.subr.mxu0 %v564_v32 }
  0xfb   :  { %v568_v34 = vpop.eup %567  ;;  %426 = vmatpush1.msra.mxu0 %v566_v33 }
  0xfc   :  { %v570_v35 = vpop.eup %569  ;;  %427 = vmatprep.subr.mxu0 %v568_v34 }
  0xfd   :  { %v572_v36 = vpop.eup %571  ;;  %428 = vmatpush1.msra.mxu0 %v570_v35 }
  0xfe   :  { %v574_v37 = vpop.eup %573  ;;  %429 = vmatprep.subr.mxu0 %v572_v36 }
  0xff   :  { %v576_v38 = vpop.eup %575  ;;  %430 = vmatpush1.msra.mxu0 %v574_v37 }
 0x100   :  { %v578_v40 = vpop.eup %577  ;;  %431 = vmatprep.subr.mxu0 %v576_v38 }
 0x101   :  { %432 = vmatpush1.msra.mxu0 %v578_v40 }
 0x102   :  { %541 = vmatmul.mubr.msk.f32.vlgmr.msra.gmra.mxu0 %vm390_vm5, %v387_v39 }
 0x1c2   :  { %v467_v42 = vpop.f32.mrf.mxu0 }
 0x1c3   :  { %v468_v43 = vadd.f32 %v467_v42, %v389_v41 }
 0x1c4   :  { %v469_v44 = vpop.f32.mrf.mxu0 }
 0x1c5   :  { %v542_v45 = vmul.f32 -1.442695, %v468_v43  ;;  %v470_v46 = vadd.f32 %v469_v44, %v389_v41 }
 0x1c7   :  { %579 = vpow2.f32 %v542_v45  ;;  %v543_v47 = vmul.f32 -1.442695, %v470_v46 }
 0x1c9   :  { %581 = vpow2.f32 %v543_v47 }
 0x1d4   :  { %v580_v48 = vpop.eup %579 }
 0x1d5   :  { %v478_v49 = vadd.f32 1.0, %v580_v48 }
 0x1d6   :  { %v582_v50 = vpop.eup %581 }
 0x1d7   :  { %v479_v51 = vadd.f32 1.0, %v582_v50  ;;  %583 = vrcp.f32 %v478_v49 }
 0x1d9   :  { %585 = vrcp.f32 %v479_v51 }
 0x1e4   :  { %v584_v57 = vpop.eup %583 }
 0x1e6   :  { %v586_v59 = vpop.eup %585 }
 0x1e7   :  { %v486_v60 = vcombine.low %v584_v57, %v586_v59 }
 0x1e9   :  { %v493_v61 = vrot.slane %v486_v60, %v492_v58 }
 0x1eb   :  { %v500_v62 = vrot.slane %v493_v61, %v492_v58 }
 0x1ed   :  { %506 = vst.msk [vmem:[#allocation3] sm:$0x3] %vm504_vm6, %v500_v62 }
 0x1ee   :  { %598 = shalt.err (!%p595_p4)
}
 0x1ef   :  { %516 = dma.vmem_to_hbm [thread:$0]  %s514_s6, 32, %s770_s7, [#allocation4]  }
 0x1f0   :  { %607 = dma.done.wait [#allocation4], 32  }
 0x1f1   :  { %608 = vsyncadd [#allocation4], 4294967264 }
 0x1f2   :  { %520 = vsyncpa [#allocation4], 1 }

</bundles_post_ra>
